<compile_context>
chip_gen: v6e
topology: v6e:2x2x1
jax: 0.10.0
libtpu: 0.0.40
codegen_flags: <defaults>
</compile_context>

<pallas_src>
import jax
import jax.numpy as jnp
from jax.experimental import pallas as pl
from jax.experimental.pallas import tpu as pltpu


def attention_kernel(x_ref, w_ref, b_ref, o_ref):
    # x_ref : (TB, S, F) block of batch rows
    # w_ref : (1, F)     weight row (resident, constant index_map)
    # b_ref : (S, 1)     bias column (resident, constant index_map)
    # o_ref : (TB, F)
    x = x_ref[...]                                   # (TB, S, F)
    w = w_ref[...]                                   # (1, F)
    bias = b_ref[...]                                # (S, 1)

    # Scores on VPU/XLU (broadcast-mul + lane reduce); keeps the MXU idle and
    # overlaps with the input DMA.
    eij = jnp.sum(x * w[None, :, :], axis=-1, keepdims=True)     # (TB, S, 1)
    eij = eij + bias[None, :, :]                                 # (TB, S, 1)
    a = jnp.exp(jnp.tanh(eij))                                   # (TB, S, 1)

    # Normalize over the step dimension. Approx reciprocal (EUP slot) + one
    # Newton-Raphson step for ~f32 accuracy.
    denom = jnp.sum(a, axis=1, keepdims=True) + 1e-10            # (TB, 1, 1)
    inv = pl.reciprocal(denom, approx=True)
    inv = inv * (2.0 - denom * inv)
    a = a * inv

    # Weighted sum over steps -> (TB, F)
    out = jnp.sum(x * a, axis=1)
    o_ref[...] = out.astype(o_ref.dtype)


def attention_forward(x, weight, bias, *, max_tb=1024):
    """x: (B, S, F); weight: (F, 1); bias: (S,) -> (B, F)."""
    B, S, F = x.shape
    itemsize = jnp.dtype(x.dtype).itemsize

    # Size the batch tile so the double-buffered x tile stays <= ~16 MiB
    # (comfortable on v7x's 64 MiB VMEM; trivially fine on v5e/v6e).
    bytes_per_row = S * F * itemsize
    tb_cap = max(8, (16 * 1024 * 1024) // (2 * bytes_per_row))
    TB = min(B, max_tb, tb_cap)

    if B > TB:
        TB = max(8, (TB // 8) * 8)        # keep the (TB, F) out block 8-aligned
        pad = (-B) % TB
        if pad:
            x = jnp.pad(x, ((0, pad), (0, 0), (0, 0)))
    else:
        TB = B                            # full batch in one tile (block == array dims)
        pad = 0
    Bp = B + pad

    w_row = weight.reshape(1, F).astype(x.dtype)
    b_col = bias.reshape(S, 1).astype(x.dtype)

    # Explicit scoped-VMEM budget with headroom for double buffering.
    tile_bytes = 2 * (TB * S * F + TB * F) * itemsize
    vmem_limit = int(min(max(2 * tile_bytes, 32 * 1024 * 1024), 64 * 1024 * 1024))

    out = pl.pallas_call(
        attention_kernel,
        out_shape=jax.ShapeDtypeStruct((Bp, F), x.dtype),
        grid_spec=pl.GridSpec(
            grid=(Bp // TB,),
            in_specs=[
                pl.BlockSpec((TB, S, F), lambda b: (b, 0, 0)),   # x: TB batch rows
                pl.BlockSpec((1, F), lambda b: (0, 0)),          # weight: resident
                pl.BlockSpec((S, 1), lambda b: (0, 0)),          # bias: resident
            ],
            out_specs=pl.BlockSpec((TB, F), lambda b: (b, 0)),
        ),
        compiler_params=pltpu.CompilerParams(
            dimension_semantics=("parallel",),
            vmem_limit_bytes=vmem_limit,
        ),
    )(x, w_row, b_col)

    return out[:B] if pad else out


def attention_reference(x, weight, bias):
    B, S, F = x.shape
    eij = (x.reshape(-1, F) @ weight).reshape(B, S) + bias
    eij = jnp.tanh(eij)
    a = jnp.exp(eij)
    a = a / (jnp.sum(a, axis=1, keepdims=True) + 1e-10)
    return jnp.sum(x * a[..., None], axis=1)


if __name__ == "__main__":
    # Small shapes consistent with the module: batch=2, step_dim=8, feature_dim=32
    B, S, F = 2, 8, 32

    key = jax.random.PRNGKey(0)
    kx, kw, kb, kx2 = jax.random.split(key, 4)

    x = jax.random.normal(kx, (B, S, F), dtype=jnp.float32)

    # Deterministic kaiming_uniform_-style init for weight (feature_dim, 1):
    # PyTorch fan_in = 1 for this shape, gain = sqrt(2) -> bound = sqrt(6).
    bound = jnp.sqrt(6.0)
    weight = jax.random.uniform(kw, (F, 1), dtype=jnp.float32,
                                minval=-bound, maxval=bound)
    bias = jnp.zeros((S,), dtype=jnp.float32)   # nn.Parameter(torch.zeros(step_dim))

    out = attention_forward(x, weight, bias)
    out = jax.block_until_ready(out)
    ref = attention_reference(x, weight, bias)
    assert out.shape == (B, F)
    assert jnp.allclose(out, ref, atol=1e-4, rtol=1e-4), "mismatch vs reference (small)"

    # Exercise the batch-blocked / padded path (multiple grid steps, TB=16).
    B2 = 50
    x2 = jax.random.normal(kx2, (B2, S, F), dtype=jnp.float32)
    bias2 = 0.1 * jax.random.normal(kb, (S,), dtype=jnp.float32)
    out2 = attention_forward(x2, weight, bias2, max_tb=16)
    out2 = jax.block_until_ready(out2)
    ref2 = attention_reference(x2, weight, bias2)
    assert out2.shape == (B2, F)
    assert jnp.allclose(out2, ref2, atol=1e-4, rtol=1e-4), "mismatch vs reference (blocked)"

    print("KERNEL_OK")
</pallas_src>

<mosaic_0001>
module attributes {stable_mosaic.version = 11 : i64} {
  func.func @attention_kernel(%arg0: i32, %arg1: memref<2x8x32xf32, #tpu.memory_space<vmem>>, %arg2: memref<1x32xf32, #tpu.memory_space<vmem>>, %arg3: memref<8x1xf32, #tpu.memory_space<vmem>>, %arg4: memref<2x32xf32, #tpu.memory_space<vmem>>) attributes {dimension_semantics = [#tpu.dimension_semantics<parallel>], iteration_bounds = array<i64: 1>, scalar_prefetch = 0 : i64, scratch_operands = 0 : i64, tpu.core_type = #tpu.core_type<tc>, window_params = [{transform_indices = @transform_0, window_bounds = array<i64: 2, 8, 32>}, {pipeline_mode = #tpu.pipeline_mode<synchronous>, transform_indices = @transform_1, window_bounds = array<i64: 1, 32>}, {pipeline_mode = #tpu.pipeline_mode<synchronous>, transform_indices = @transform_2, window_bounds = array<i64: 8, 1>}, {transform_indices = @transform_3, window_bounds = array<i64: 2, 32>}]} {
    %c0 = arith.constant 0 : index
    %c0_0 = arith.constant 0 : index
    %c0_1 = arith.constant 0 : index
    %0 = vector.load %arg1[%c0, %c0_0, %c0_1] : memref<2x8x32xf32, #tpu.memory_space<vmem>>, vector<2x8x32xf32>
    %c0_2 = arith.constant 0 : index
    %c0_3 = arith.constant 0 : index
    %1 = vector.load %arg2[%c0_2, %c0_3] : memref<1x32xf32, #tpu.memory_space<vmem>>, vector<1x32xf32>
    %c0_4 = arith.constant 0 : index
    %c0_5 = arith.constant 0 : index
    %2 = vector.load %arg3[%c0_4, %c0_5] : memref<8x1xf32, #tpu.memory_space<vmem>>, vector<8x1xf32>
    %3 = vector.shape_cast %1 : vector<1x32xf32> to vector<1x1x32xf32>
    %4 = vector.broadcast %3 : vector<1x1x32xf32> to vector<2x8x32xf32>
    %5 = arith.mulf %0, %4 : vector<2x8x32xf32>
    %cst = arith.constant dense<0.000000e+00> : vector<2x8xf32>
    %6 = vector.multi_reduction <add>, %5, %cst [2] : vector<2x8x32xf32> to vector<2x8xf32>
    %7 = vector.shape_cast %6 : vector<2x8xf32> to vector<2x8x1xf32>
    %8 = vector.shape_cast %2 : vector<8x1xf32> to vector<1x8x1xf32>
    %9 = vector.broadcast %8 : vector<1x8x1xf32> to vector<2x8x1xf32>
    %10 = arith.addf %7, %9 : vector<2x8x1xf32>
    %11 = math.tanh %10 : vector<2x8x1xf32>
    %12 = math.exp %11 : vector<2x8x1xf32>
    %cst_6 = arith.constant dense<0.000000e+00> : vector<2x1xf32>
    %13 = vector.multi_reduction <add>, %12, %cst_6 [1] : vector<2x8x1xf32> to vector<2x1xf32>
    %14 = vector.shape_cast %13 : vector<2x1xf32> to vector<2x1x1xf32>
    %cst_7 = arith.constant 1.000000e-10 : f32
    %15 = vector.broadcast %cst_7 : f32 to vector<2x1x1xf32>
    %16 = arith.addf %14, %15 : vector<2x1x1xf32>
    %17 = tpu.reciprocal %16 {approx = true} : vector<2x1x1xf32> -> vector<2x1x1xf32>
    %18 = arith.mulf %16, %17 : vector<2x1x1xf32>
    %cst_8 = arith.constant 2.000000e+00 : f32
    %19 = vector.broadcast %cst_8 : f32 to vector<2x1x1xf32>
    %20 = arith.subf %19, %18 : vector<2x1x1xf32>
    %21 = arith.mulf %17, %20 : vector<2x1x1xf32>
    %22 = vector.broadcast %21 : vector<2x1x1xf32> to vector<2x8x1xf32>
    %23 = arith.mulf %12, %22 : vector<2x8x1xf32>
    %24 = vector.broadcast %23 : vector<2x8x1xf32> to vector<2x8x32xf32>
    %25 = arith.mulf %0, %24 : vector<2x8x32xf32>
    %cst_9 = arith.constant dense<0.000000e+00> : vector<2x32xf32>
    %26 = vector.multi_reduction <add>, %25, %cst_9 [1] : vector<2x8x32xf32> to vector<2x32xf32>
    %c0_10 = arith.constant 0 : index
    %c0_11 = arith.constant 0 : index
    %27 = vector.load %arg4[%c0_10, %c0_11] : memref<2x32xf32, #tpu.memory_space<vmem>>, vector<2x32xf32>
    tpu.vector_store %arg4[%c0_10, %c0_11], %26 {strides = array<i32>} : memref<2x32xf32, #tpu.memory_space<vmem>>, vector<2x32xf32>,
    return
  }
  func.func @transform_0(%arg0: i32) -> (i32, i32, i32) {
    %c0_i32 = arith.constant 0 : i32
    %c0_i32_0 = arith.constant 0 : i32
    %c0_i32_1 = arith.constant 0 : i32
    return %arg0, %c0_i32, %c0_i32_0 : i32, i32, i32
  }
  func.func @transform_1(%arg0: i32) -> (i32, i32) {
    %c0_i32 = arith.constant 0 : i32
    %c0_i32_0 = arith.constant 0 : i32
    %c0_i32_1 = arith.constant 0 : i32
    return %c0_i32, %c0_i32_0 : i32, i32
  }
  func.func @transform_2(%arg0: i32) -> (i32, i32) {
    %c0_i32 = arith.constant 0 : i32
    %c0_i32_0 = arith.constant 0 : i32
    %c0_i32_1 = arith.constant 0 : i32
    return %c0_i32, %c0_i32_0 : i32, i32
  }
  func.func @transform_3(%arg0: i32) -> (i32, i32) {
    %c0_i32 = arith.constant 0 : i32
    %c0_i32_0 = arith.constant 0 : i32
    return %arg0, %c0_i32 : i32, i32
  }
}

</mosaic_0001>

<bundles_post_ra>
// kernel: tpu_custom_call.1
= control target key start
LH: loop header
LB: loop body
LE: loop exit
PB: predicated region body
PF: predicated region fallthrough
CT: control target
= control target key end

     0   :  { %8 = vsyncpa [#allocation3], 0  ;;  %s236_s0 = inlined_call_operand.hbm [shape: f32[2,8,32], index: 0, kind: input, shape index: {}]   ;;  %s237_s1 = inlined_call_operand.vmem [shape: f32[1,32], index: 1, kind: input, shape index: {}]   ;;  %s238_s2 = inlined_call_operand.vmem [shape: f32[8,1], index: 2, kind: input, shape index: {}]   ;;  %s239_s3 = inlined_call_operand.hbm [shape: f32[2,32], index: 3, kind: output, shape index: {}]  }
   0x1   :  { %9 = vsyncpa [#allocation4], 0  ;;  %s195_s12 = smov [#allocation2]  }
   0x2   :  { %s15_s13 = sshll.u32 %s195_s12, 4  ;;  %s16_s13 = int_to_ptr.vmem [resolvable:$true] %s15_s13 }
   0x3   :  { %s159_s14 = scalar_lea.vmem %s16_s13, 256  ;;  %p164_p1 = scmp.lt.s32.totalorder %s16_s13, %s16_s13 }
   0x4   :  { %p160_p0 = scmp.ne.s32.totalorder %s16_s13, %s159_s14  ;;  %p165_p2 = scmp.lt.s32.totalorder %s159_s14, %s159_s14 }
   0x6   :  { %p166_p3 = por %p165_p2, %p164_p1 }
   0x8   :  { %p167_p4 = pnand %p166_p3, %p160_p0 }
   0xa   :  { %170 = shalt.err (!%p167_p4)
}
   0xb   :  { %s196_s15 = smov 128   ;;  %s197_s16 = smov 8  }
   0xc   :  { %21 = dma.hbm_to_vmem [thread:$0]  %s236_s0, 256, %s16_s13, [#allocation3], %s196_s15, %s196_s15, %s197_s16  }
   0xd   :  { %191 = dma.done.wait [#allocation3], 256  }
   0xe   :  { %192 = vsyncadd [#allocation3], 4294967040  ;;  %v29_v0 = vld [vmem:[#allocation2] sm:$0xff]  ;;  %vm41_vm0 = vcmask 261120   ;;  %v30_v2 = vld [vmem:[#allocation2 + $0x8] sm:$0xff]  ;;  %v198_v7 = vmov 0  }
   0xf   :  { %v131_v1 = vld [vmem:[%s237_s1] ss:$0 sm:$0xff]  ;;  %137 = vset.pattern.permute.xlu1 %v198_v7  ;;  %138 = vset.pattern.permute.xlu0 %v198_v7  ;;  %vm56_vm1 = vcmask 7168   ;;  %s199_s1 = smov [#allocation5]   ;;  %vm111_vm2 = vcmask 1041409   ;;  %vm114_vm3 = vcmask 254976  }
  0x10   :  { %v39_v3 = vmul.f32 %v131_v1, %v29_v0  ;;  %v40_v4 = vmul.f32 %v131_v1, %v30_v2  ;;  %v32_v8 = vld [vmem:[%s238_s2] sm:$0xff]  ;;  %s122_s2 = sshll.u32 %s199_s1, 4  ;;  %s123_s2 = int_to_ptr.vmem [resolvable:$true] %s122_s2 }
  0x11   :  { %s171_s22 = scalar_lea.vmem %s123_s2, 32  ;;  %p176_p6 = scmp.lt.s32.totalorder %s123_s2, %s123_s2 }
  0x12   :  { %v42_v5 = vsel %vm41_vm0, %v39_v3, 0.0  ;;  %v45_v6 = vsel %vm41_vm0, %v40_v4, 0.0  ;;  %p172_p5 = scmp.ne.s32.totalorder %s123_s2, %s171_s22  ;;  %p177_p7 = scmp.lt.s32.totalorder %s171_s22, %s171_s22 }
  0x13   :  { %43 = vadd.xlane.f32.xlu0 %v42_v5 }
  0x14   :  { %p178_p8 = por %p177_p7, %p176_p6 }
  0x16   :  { %p179_p9 = pnand %p178_p8, %p172_p5 }
  0x17   :  { %46 = vadd.xlane.f32.xlu0 %v45_v6 }
  0x9c   :  { %v44_v9 = vpop.xlane.xlu0 %43 }
  0x9d   :  { %v48_v10 = vadd.f32 %v44_v9, %v32_v8 }
  0x9f   :  { %139 = vtanh.f32 %v48_v10 }
  0xa0   :  { %v47_v11 = vpop.xlane.xlu0 %46 }
  0xa1   :  { %v49_v12 = vadd.f32 %v47_v11, %v32_v8 }
  0xa3   :  { %141 = vtanh.f32 %v49_v12 }
  0xac   :  { %v140_v13 = vpop.eup %139 }
  0xad   :  { %v52_v14 = vmul.f32 1.442695, %v140_v13 }
  0xaf   :  { %143 = vpow2.f32 %v52_v14 }
  0xb0   :  { %v142_v15 = vpop.eup %141 }
  0xb1   :  { %v54_v16 = vmul.f32 1.442695, %v142_v15 }
  0xb3   :  { %145 = vpow2.f32 %v54_v16 }
  0xbc   :  { %v144_v17 = vpop.eup %143 }
  0xbd   :  { %v57_v18 = vsel %vm56_vm1, %v144_v17, 0.0 }
  0xbe   :  { %v58_v19 = vrot.slane %v57_v18, 4 }
  0xc0   :  { %v146_v20 = vpop.eup %145  ;;  %v59_v21 = vadd.f32 %v58_v19, %v57_v18 }
  0xc1   :  { %v64_v22 = vsel %vm56_vm1, %v146_v20, 0.0 }
  0xc2   :  { %v60_v23 = vrot.slane %v59_v21, 2  ;;  %v65_v24 = vrot.slane %v64_v22, 4 }
  0xc4   :  { %v61_v25 = vadd.f32 %v60_v23, %v59_v21  ;;  %v66_v26 = vadd.f32 %v65_v24, %v64_v22 }
  0xc6   :  { %v62_v27 = vrot.slane %v61_v25, 1  ;;  %v67_v28 = vrot.slane %v66_v26, 2 }
  0xc8   :  { %v63_v29 = vadd.f32 %v62_v27, %v61_v25  ;;  %v68_v30 = vadd.f32 %v67_v28, %v66_v26 }
  0xca   :  { %v71_v31 = vadd.f32 1e-10, %v63_v29  ;;  %v69_v32 = vrot.slane %v68_v30, 1 }
  0xcc   :  { %147 = vrcp.f32 %v71_v31  ;;  %v70_v33 = vadd.f32 %v69_v32, %v68_v30 }
  0xce   :  { %v72_v34 = vadd.f32 1e-10, %v70_v33 }
  0xd0   :  { %149 = vrcp.f32 %v72_v34 }
  0xd9   :  { %v148_v35 = vpop.eup %147 }
  0xda   :  { %v75_v36 = vmul.f32 %v148_v35, %v71_v31 }
  0xdc   :  { %v77_v37 = vsub.f32 2.0, %v75_v36 }
  0xdd   :  { %v150_v38 = vpop.eup %149 }
  0xde   :  { %v79_v39 = vmul.f32 %v148_v35, %v77_v37  ;;  %v76_v40 = vmul.f32 %v150_v38, %v72_v34 }
  0xe0   :  { %v81_v41 = vmul.f32 %v144_v17, %v79_v39  ;;  %v78_v42 = vsub.f32 2.0, %v76_v40 }
  0xe2   :  { %85 = vperm.xlu1 %137, %v81_v41   ;;  %v80_v43 = vmul.f32 %v150_v38, %v78_v42 }
  0xe4   :  { %v82_v44 = vmul.f32 %v146_v20, %v80_v43 }
  0xe6   :  { %90 = vperm.xlu1 %137, %v82_v44  }
 0x15d   :  { %v86_v45 = vpop.permute.xlu1 %85 }
 0x15e   :  { %v93_v46 = vmul.f32 %v86_v45, %v29_v0 }
 0x160   :  { %v95_v47 = vsel %vm41_vm0, %v93_v46, 0.0 }
 0x161   :  { %v96_v48 = vrot.slane %v95_v47, 4  ;;  %v91_v49 = vpop.permute.xlu1 %90 }
 0x162   :  { %v94_v50 = vmul.f32 %v91_v49, %v30_v2 }
 0x163   :  { %v97_v51 = vadd.f32 %v96_v48, %v95_v47 }
 0x164   :  { %v102_v52 = vsel %vm41_vm0, %v94_v50, 0.0 }
 0x165   :  { %v98_v53 = vrot.slane %v97_v51, 2  ;;  %v103_v54 = vrot.slane %v102_v52, 4 }
 0x167   :  { %v99_v55 = vadd.f32 %v98_v53, %v97_v51  ;;  %v104_v56 = vadd.f32 %v103_v54, %v102_v52 }
 0x169   :  { %v105_v57 = vrot.slane %v104_v56, 2  ;;  %v100_v58 = vrot.slane %v99_v55, 1 }
 0x16b   :  { %v106_v59 = vadd.f32 %v105_v57, %v104_v56  ;;  %v101_v61 = vadd.f32 %v100_v58, %v99_v55 }
 0x16d   :  { %v107_v60 = vrot.slane %v106_v59, 1 }
 0x16f   :  { %v108_v62 = vadd.f32 %v107_v60, %v106_v59 }
 0x171   :  { %v112_v63 = vsel %vm111_vm2, %v108_v62, %v101_v61 }
 0x172   :  { %115 = vst.msk [vmem:[#allocation5] sm:$0x3] %vm114_vm3, %v112_v63 }
 0x173   :  { %182 = shalt.err (!%p179_p9)
}
 0x174   :  { %125 = dma.vmem_to_hbm [thread:$0]  %s123_s2, 32, %s239_s3, [#allocation4]  }
 0x175   :  { %193 = dma.done.wait [#allocation4], 32  }
 0x176   :  { %194 = vsyncadd [#allocation4], 4294967264 }
 0x177   :  { %129 = vsyncpa [#allocation3], 1 }
 0x178   :  { %130 = vsyncpa [#allocation4], 1 }

</bundles_post_ra>
